<compile_context>
chip_gen: v5e
topology: v5e:2x2
jax: 0.10.0
libtpu: 0.0.40
codegen_flags: <defaults>
</compile_context>

<pallas_src>
import functools
import numpy as np

import jax
import jax.numpy as jnp
from jax.experimental import pallas as pl
from jax.experimental.pallas import tpu as pltpu

LN_EPS = 1e-5  # PyTorch nn.LayerNorm default
_SQRT_HALF = 0.7071067811865476


# ----------------------------- GELU (exact, erf) ------------------------------
def _erf_approx(z):
    # Abramowitz & Stegun 7.1.26, max abs error ~1.5e-7; uses only exp/mul/add,
    # which always lower on the TPU VPU/EUP (no dependence on lax.erf lowering).
    a1, a2, a3, a4, a5 = (0.254829592, -0.284496736, 1.421413741,
                          -1.453152027, 1.061405429)
    p_ = 0.3275911
    az = jnp.abs(z)
    t = 1.0 / (1.0 + p_ * az)
    poly = ((((a5 * t + a4) * t + a3) * t + a2) * t + a1) * t
    y = 1.0 - poly * jnp.exp(-az * az)
    return jnp.where(z < 0.0, -y, y)


def _gelu_exact(z):
    return 0.5 * z * (1.0 + _erf_approx(z * _SQRT_HALF))


# ------------------------------- kernel ---------------------------------------
def _block_kernel(x_ref, g1_ref, b1_ref, wq_ref, wk_ref, wv_ref, wp_ref, bp_ref,
                  g2_ref, b2_ref, w1_ref, bb1_ref, w2_ref, bb2_ref, o_ref,
                  *, num_heads, head_dim):
    x = x_ref[0].astype(jnp.float32)  # (N, C)

    def layernorm(z, g, b):
        mu = jnp.mean(z, axis=-1, keepdims=True)
        var = jnp.mean(jnp.square(z - mu), axis=-1, keepdims=True)
        return (z - mu) * jax.lax.rsqrt(var + LN_EPS) * g + b

    # ---------------- attention branch ----------------
    xn = layernorm(x, g1_ref[...], b1_ref[...]).astype(jnp.bfloat16)
    # bf16 inputs, fp32 accumulation.  scale is pre-folded into wq host-side.
    q = jnp.dot(xn, wq_ref[...], preferred_element_type=jnp.float32)  # (N, C)
    k = jnp.dot(xn, wk_ref[...], preferred_element_type=jnp.float32)
    v = jnp.dot(xn, wv_ref[...], preferred_element_type=jnp.float32)

    def split_heads(t):
        # (N, C) -> (H, N, Dh): static lane slices + leading-axis stack
        # (no transposes, no lane-axis concat).
        return jnp.stack(
            [t[:, h * head_dim:(h + 1) * head_dim] for h in range(num_heads)],
            axis=0)

    qh = split_heads(q.astype(jnp.bfloat16))   # (H, N, Dh)
    kh = split_heads(k.astype(jnp.bfloat16))
    vh = split_heads(v.astype(jnp.bfloat16))

    # Batched scores over all heads; contraction is last-with-last (no kh.T).
    s = jnp.einsum('hnd,hmd->hnm', qh, kh,
                   preferred_element_type=jnp.float32)          # (H, N, N) fp32
    s_max = jnp.max(s, axis=-1, keepdims=True)
    p = jnp.exp(s - s_max)
    p = p * pl.reciprocal(jnp.sum(p, axis=-1, keepdims=True), approx=True)

    o_heads = jnp.einsum('hnm,hmd->hnd', p.astype(jnp.bfloat16), vh,
                         preferred_element_type=jnp.float32)    # (H, N, Dh)

    # Output projection folded per head (wp is pre-reshaped to (H, Dh, C)):
    # attn_out = sum_h o_heads[h] @ wp[h]  — no lane-axis concat needed.
    proj = jnp.einsum('hnd,hdc->hnc', o_heads.astype(jnp.bfloat16), wp_ref[...],
                      preferred_element_type=jnp.float32)       # (H, N, C)
    attn_out = jnp.sum(proj, axis=0) + bp_ref[...]
    x1 = x + attn_out

    # ---------------- MLP branch ----------------
    xn2 = layernorm(x1, g2_ref[...], b2_ref[...]).astype(jnp.bfloat16)
    h1 = jnp.dot(xn2, w1_ref[...], preferred_element_type=jnp.float32) + bb1_ref[...]
    h1 = _gelu_exact(h1).astype(jnp.bfloat16)
    m = jnp.dot(h1, w2_ref[...], preferred_element_type=jnp.float32) + bb2_ref[...]

    o_ref[0] = (x1 + m).astype(o_ref.dtype)


# ------------------------------- wrapper ---------------------------------------
def prepare_kernel_params(p, *, num_heads):
    """fp32 (in,out)-layout params -> kernel params (bf16 weights, folded scale,
    per-head-reshaped output projection, (1,dim) fp32 biases/LN params)."""
    C = p["wq"].shape[0]
    hd = C // num_heads
    scale = hd ** (-0.5)
    f32 = jnp.float32
    bf16 = jnp.bfloat16
    return {
        "g1": p["g1"].astype(f32).reshape(1, C),
        "b1": p["b1"].astype(f32).reshape(1, C),
        "wq": (p["wq"] * scale).astype(bf16),          # softmax scale folded in
        "wk": p["wk"].astype(bf16),
        "wv": p["wv"].astype(bf16),
        "wp": p["wp"].reshape(num_heads, hd, C).astype(bf16),   # (H, Dh, C)
        "bp": p["bp"].astype(f32).reshape(1, C),
        "g2": p["g2"].astype(f32).reshape(1, C),
        "b2": p["b2"].astype(f32).reshape(1, C),
        "w1": p["w1"].astype(bf16),
        "bb1": p["bb1"].astype(f32).reshape(1, -1),
        "w2": p["w2"].astype(bf16),
        "bb2": p["bb2"].astype(f32).reshape(1, C),
    }


def transformer_block(x, kparams, *, num_heads):
    B, N, C = x.shape
    head_dim = C // num_heads

    kernel = functools.partial(_block_kernel, num_heads=num_heads, head_dim=head_dim)

    param_order = ("g1", "b1", "wq", "wk", "wv", "wp", "bp",
                   "g2", "b2", "w1", "bb1", "w2", "bb2")
    param_arrays = [kparams[k] for k in param_order]

    in_specs = [pl.BlockSpec((1, N, C), lambda b: (b, 0, 0))]
    for a in param_arrays:
        # bind ndim now (avoid late-binding lambda bug)
        in_specs.append(pl.BlockSpec(a.shape, lambda b, nd=a.ndim: (0,) * nd))

    fn = pl.pallas_call(
        kernel,
        out_shape=jax.ShapeDtypeStruct((B, N, C), x.dtype),
        grid=(B,),
        in_specs=in_specs,
        out_specs=pl.BlockSpec((1, N, C), lambda b: (b, 0, 0)),
        compiler_params=pltpu.CompilerParams(
            dimension_semantics=("parallel",),
            vmem_limit_bytes=48 * 1024 * 1024,
        ),
    )
    return fn(x, *param_arrays)


# ------------------------- pure-JAX fp32 reference -----------------------------
def block_reference(x, p, *, num_heads):
    B, N, C = x.shape
    hd = C // num_heads
    scale = hd ** (-0.5)

    def ln(z, g, b):
        mu = jnp.mean(z, axis=-1, keepdims=True)
        var = jnp.mean((z - mu) ** 2, axis=-1, keepdims=True)
        return (z - mu) / jnp.sqrt(var + LN_EPS) * g + b

    def gelu(z):  # PyTorch nn.GELU() default: exact erf
        return 0.5 * z * (1.0 + jax.lax.erf(z / np.sqrt(2.0)))

    xn = ln(x, p["g1"], p["b1"])
    q = (xn @ p["wq"]).reshape(B, N, num_heads, hd).transpose(0, 2, 1, 3)
    k = (xn @ p["wk"]).reshape(B, N, num_heads, hd).transpose(0, 2, 1, 3)
    v = (xn @ p["wv"]).reshape(B, N, num_heads, hd).transpose(0, 2, 1, 3)
    attn = jax.nn.softmax((q @ jnp.swapaxes(k, -2, -1)) * scale, axis=-1)
    a = (attn @ v).transpose(0, 2, 1, 3).reshape(B, N, C)
    a = a @ p["wp"] + p["bp"]
    x1 = x + a
    xn2 = ln(x1, p["g2"], p["b2"])
    m = gelu(xn2 @ p["w1"] + p["bb1"]) @ p["w2"] + p["bb2"]
    return x1 + m


# ---------------------------------- main ----------------------------------------
if __name__ == "__main__":
    B, N, C = 2, 8, 32
    NUM_HEADS = 4
    MLP_RATIO = 4.0
    HIDDEN = int(C * MLP_RATIO)

    key = jax.random.PRNGKey(0)
    keys = jax.random.split(key, 16)
    x = jax.random.normal(keys[0], (B, N, C), dtype=jnp.float32)

    def init_w(k, shape, s=0.02):
        return s * jax.random.normal(k, shape, dtype=jnp.float32)

    params = {
        "g1": 1.0 + init_w(keys[7], (C,), 0.1),
        "b1": init_w(keys[8], (C,), 0.1),
        "wq": init_w(keys[1], (C, C)),        # (in, out) layout
        "wk": init_w(keys[2], (C, C)),
        "wv": init_w(keys[3], (C, C)),
        "wp": init_w(keys[4], (C, C)),
        "bp": init_w(keys[9], (C,)),
        "g2": 1.0 + init_w(keys[10], (C,), 0.1),
        "b2": init_w(keys[11], (C,), 0.1),
        "w1": init_w(keys[5], (C, HIDDEN)),
        "bb1": init_w(keys[12], (HIDDEN,)),
        "w2": init_w(keys[6], (HIDDEN, C)),
        "bb2": init_w(keys[13], (C,)),
    }

    kparams = prepare_kernel_params(params, num_heads=NUM_HEADS)

    out = transformer_block(x, kparams, num_heads=NUM_HEADS)
    out = jax.block_until_ready(out)

    ref = block_reference(x, params, num_heads=NUM_HEADS)
    ref = jax.block_until_ready(ref)

    # Tolerance accounts for bf16 matmul inputs (fp32 accumulation) in the kernel
    # vs. the fully-fp32 reference.
    np.testing.assert_allclose(np.asarray(out), np.asarray(ref), rtol=2e-2, atol=2e-2)
    print("KERNEL_OK")
</pallas_src>

<mosaic_0001>
module attributes {stable_mosaic.version = 11 : i64} {
  func.func @_block_kernel(%arg0: i32, %arg1: memref<1x8x32xf32, #tpu.memory_space<vmem>>, %arg2: memref<1x32xf32, #tpu.memory_space<vmem>>, %arg3: memref<1x32xf32, #tpu.memory_space<vmem>>, %arg4: memref<32x32xbf16, #tpu.memory_space<vmem>>, %arg5: memref<32x32xbf16, #tpu.memory_space<vmem>>, %arg6: memref<32x32xbf16, #tpu.memory_space<vmem>>, %arg7: memref<4x8x32xbf16, #tpu.memory_space<vmem>>, %arg8: memref<1x32xf32, #tpu.memory_space<vmem>>, %arg9: memref<1x32xf32, #tpu.memory_space<vmem>>, %arg10: memref<1x32xf32, #tpu.memory_space<vmem>>, %arg11: memref<32x128xbf16, #tpu.memory_space<vmem>>, %arg12: memref<1x128xf32, #tpu.memory_space<vmem>>, %arg13: memref<128x32xbf16, #tpu.memory_space<vmem>>, %arg14: memref<1x32xf32, #tpu.memory_space<vmem>>, %arg15: memref<1x8x32xf32, #tpu.memory_space<vmem>>) attributes {dimension_semantics = [#tpu.dimension_semantics<parallel>], iteration_bounds = array<i64: 2>, scalar_prefetch = 0 : i64, scratch_operands = 0 : i64, tpu.core_type = #tpu.core_type<tc>, window_params = [{transform_indices = @transform_0, window_bounds = array<i64: 1, 8, 32>}, {pipeline_mode = #tpu.pipeline_mode<synchronous>, transform_indices = @transform_1, window_bounds = array<i64: 1, 32>}, {pipeline_mode = #tpu.pipeline_mode<synchronous>, transform_indices = @transform_2, window_bounds = array<i64: 1, 32>}, {pipeline_mode = #tpu.pipeline_mode<synchronous>, transform_indices = @transform_3, window_bounds = array<i64: 32, 32>}, {pipeline_mode = #tpu.pipeline_mode<synchronous>, transform_indices = @transform_4, window_bounds = array<i64: 32, 32>}, {pipeline_mode = #tpu.pipeline_mode<synchronous>, transform_indices = @transform_5, window_bounds = array<i64: 32, 32>}, {pipeline_mode = #tpu.pipeline_mode<synchronous>, transform_indices = @transform_6, window_bounds = array<i64: 4, 8, 32>}, {pipeline_mode = #tpu.pipeline_mode<synchronous>, transform_indices = @transform_7, window_bounds = array<i64: 1, 32>}, {pipeline_mode = #tpu.pipeline_mode<synchronous>, transform_indices = @transform_8, window_bounds = array<i64: 1, 32>}, {pipeline_mode = #tpu.pipeline_mode<synchronous>, transform_indices = @transform_9, window_bounds = array<i64: 1, 32>}, {pipeline_mode = #tpu.pipeline_mode<synchronous>, transform_indices = @transform_10, window_bounds = array<i64: 32, 128>}, {pipeline_mode = #tpu.pipeline_mode<synchronous>, transform_indices = @transform_11, window_bounds = array<i64: 1, 128>}, {pipeline_mode = #tpu.pipeline_mode<synchronous>, transform_indices = @transform_12, window_bounds = array<i64: 128, 32>}, {pipeline_mode = #tpu.pipeline_mode<synchronous>, transform_indices = @transform_13, window_bounds = array<i64: 1, 32>}, {transform_indices = @transform_14, window_bounds = array<i64: 1, 8, 32>}]} {
    %c0 = arith.constant 0 : index
    %c0_0 = arith.constant 0 : index
    %c0_1 = arith.constant 0 : index
    %0 = vector.load %arg1[%c0, %c0_0, %c0_1] : memref<1x8x32xf32, #tpu.memory_space<vmem>>, vector<1x8x32xf32>
    %1 = vector.shape_cast %0 : vector<1x8x32xf32> to vector<8x32xf32>
    %c0_2 = arith.constant 0 : index
    %c0_3 = arith.constant 0 : index
    %2 = vector.load %arg2[%c0_2, %c0_3] : memref<1x32xf32, #tpu.memory_space<vmem>>, vector<1x32xf32>
    %c0_4 = arith.constant 0 : index
    %c0_5 = arith.constant 0 : index
    %3 = vector.load %arg3[%c0_4, %c0_5] : memref<1x32xf32, #tpu.memory_space<vmem>>, vector<1x32xf32>
    %cst = arith.constant dense<0.000000e+00> : vector<8xf32>
    %4 = vector.multi_reduction <add>, %1, %cst [1] : vector<8x32xf32> to vector<8xf32>
    %5 = vector.shape_cast %4 : vector<8xf32> to vector<8x1xf32>
    %cst_6 = arith.constant 3.200000e+01 : f32
    %6 = vector.broadcast %cst_6 : f32 to vector<8x1xf32>
    %7 = arith.divf %5, %6 : vector<8x1xf32>
    %8 = vector.broadcast %7 : vector<8x1xf32> to vector<8x32xf32>
    %9 = arith.subf %1, %8 : vector<8x32xf32>
    %10 = arith.mulf %9, %9 : vector<8x32xf32>
    %cst_7 = arith.constant dense<0.000000e+00> : vector<8xf32>
    %11 = vector.multi_reduction <add>, %10, %cst_7 [1] : vector<8x32xf32> to vector<8xf32>
    %12 = vector.shape_cast %11 : vector<8xf32> to vector<8x1xf32>
    %cst_8 = arith.constant 3.200000e+01 : f32
    %13 = vector.broadcast %cst_8 : f32 to vector<8x1xf32>
    %14 = arith.divf %12, %13 : vector<8x1xf32>
    %15 = vector.broadcast %7 : vector<8x1xf32> to vector<8x32xf32>
    %16 = arith.subf %1, %15 : vector<8x32xf32>
    %cst_9 = arith.constant 9.99999974E-6 : f32
    %17 = vector.broadcast %cst_9 : f32 to vector<8x1xf32>
    %18 = arith.addf %14, %17 : vector<8x1xf32>
    %19 = math.rsqrt %18 : vector<8x1xf32>
    %20 = vector.broadcast %19 : vector<8x1xf32> to vector<8x32xf32>
    %21 = arith.mulf %16, %20 : vector<8x32xf32>
    %22 = vector.broadcast %2 : vector<1x32xf32> to vector<8x32xf32>
    %23 = arith.mulf %21, %22 : vector<8x32xf32>
    %24 = vector.broadcast %3 : vector<1x32xf32> to vector<8x32xf32>
    %25 = arith.addf %23, %24 : vector<8x32xf32>
    %26 = arith.truncf %25 : vector<8x32xf32> to vector<8x32xbf16>
    %c0_10 = arith.constant 0 : index
    %c0_11 = arith.constant 0 : index
    %27 = vector.load %arg4[%c0_10, %c0_11] : memref<32x32xbf16, #tpu.memory_space<vmem>>, vector<32x32xbf16>
    %cst_12 = arith.constant dense<0.000000e+00> : vector<8x32xf32>
    %28 = tpu.matmul %26, %27, %cst_12 {dimension_numbers = #tpu.dot_dimension_numbers<[1], [0], [0], [1], [0, 0, 1, 1], [], []>} : vector<8x32xbf16>, vector<32x32xbf16>, vector<8x32xf32> -> vector<8x32xf32>
    %c0_13 = arith.constant 0 : index
    %c0_14 = arith.constant 0 : index
    %29 = vector.load %arg5[%c0_13, %c0_14] : memref<32x32xbf16, #tpu.memory_space<vmem>>, vector<32x32xbf16>
    %cst_15 = arith.constant dense<0.000000e+00> : vector<8x32xf32>
    %30 = tpu.matmul %26, %29, %cst_15 {dimension_numbers = #tpu.dot_dimension_numbers<[1], [0], [0], [1], [0, 0, 1, 1], [], []>} : vector<8x32xbf16>, vector<32x32xbf16>, vector<8x32xf32> -> vector<8x32xf32>
    %c0_16 = arith.constant 0 : index
    %c0_17 = arith.constant 0 : index
    %31 = vector.load %arg6[%c0_16, %c0_17] : memref<32x32xbf16, #tpu.memory_space<vmem>>, vector<32x32xbf16>
    %cst_18 = arith.constant dense<0.000000e+00> : vector<8x32xf32>
    %32 = tpu.matmul %26, %31, %cst_18 {dimension_numbers = #tpu.dot_dimension_numbers<[1], [0], [0], [1], [0, 0, 1, 1], [], []>} : vector<8x32xbf16>, vector<32x32xbf16>, vector<8x32xf32> -> vector<8x32xf32>
    %33 = arith.truncf %28 : vector<8x32xf32> to vector<8x32xbf16>
    %34 = vector.extract_strided_slice %33 {offsets = [0, 0], sizes = [8, 8], strides = [1, 1]} : vector<8x32xbf16> to vector<8x8xbf16>
    %35 = vector.extract_strided_slice %33 {offsets = [0, 8], sizes = [8, 8], strides = [1, 1]} : vector<8x32xbf16> to vector<8x8xbf16>
    %36 = vector.extract_strided_slice %33 {offsets = [0, 16], sizes = [8, 8], strides = [1, 1]} : vector<8x32xbf16> to vector<8x8xbf16>
    %37 = vector.extract_strided_slice %33 {offsets = [0, 24], sizes = [8, 8], strides = [1, 1]} : vector<8x32xbf16> to vector<8x8xbf16>
    %38 = vector.shape_cast %34 : vector<8x8xbf16> to vector<1x8x8xbf16>
    %39 = vector.shape_cast %35 : vector<8x8xbf16> to vector<1x8x8xbf16>
    %40 = vector.shape_cast %36 : vector<8x8xbf16> to vector<1x8x8xbf16>
    %41 = vector.shape_cast %37 : vector<8x8xbf16> to vector<1x8x8xbf16>
    %42 = tpu.concatenate %38, %39, %40, %41 in 0 : vector<1x8x8xbf16>, vector<1x8x8xbf16>, vector<1x8x8xbf16>, vector<1x8x8xbf16> -> vector<4x8x8xbf16>
    %43 = arith.truncf %30 : vector<8x32xf32> to vector<8x32xbf16>
    %44 = vector.extract_strided_slice %43 {offsets = [0, 0], sizes = [8, 8], strides = [1, 1]} : vector<8x32xbf16> to vector<8x8xbf16>
    %45 = vector.extract_strided_slice %43 {offsets = [0, 8], sizes = [8, 8], strides = [1, 1]} : vector<8x32xbf16> to vector<8x8xbf16>
    %46 = vector.extract_strided_slice %43 {offsets = [0, 16], sizes = [8, 8], strides = [1, 1]} : vector<8x32xbf16> to vector<8x8xbf16>
    %47 = vector.extract_strided_slice %43 {offsets = [0, 24], sizes = [8, 8], strides = [1, 1]} : vector<8x32xbf16> to vector<8x8xbf16>
    %48 = vector.shape_cast %44 : vector<8x8xbf16> to vector<1x8x8xbf16>
    %49 = vector.shape_cast %45 : vector<8x8xbf16> to vector<1x8x8xbf16>
    %50 = vector.shape_cast %46 : vector<8x8xbf16> to vector<1x8x8xbf16>
    %51 = vector.shape_cast %47 : vector<8x8xbf16> to vector<1x8x8xbf16>
    %52 = tpu.concatenate %48, %49, %50, %51 in 0 : vector<1x8x8xbf16>, vector<1x8x8xbf16>, vector<1x8x8xbf16>, vector<1x8x8xbf16> -> vector<4x8x8xbf16>
    %53 = arith.truncf %32 : vector<8x32xf32> to vector<8x32xbf16>
    %54 = vector.extract_strided_slice %53 {offsets = [0, 0], sizes = [8, 8], strides = [1, 1]} : vector<8x32xbf16> to vector<8x8xbf16>
    %55 = vector.extract_strided_slice %53 {offsets = [0, 8], sizes = [8, 8], strides = [1, 1]} : vector<8x32xbf16> to vector<8x8xbf16>
    %56 = vector.extract_strided_slice %53 {offsets = [0, 16], sizes = [8, 8], strides = [1, 1]} : vector<8x32xbf16> to vector<8x8xbf16>
    %57 = vector.extract_strided_slice %53 {offsets = [0, 24], sizes = [8, 8], strides = [1, 1]} : vector<8x32xbf16> to vector<8x8xbf16>
    %58 = vector.shape_cast %54 : vector<8x8xbf16> to vector<1x8x8xbf16>
    %59 = vector.shape_cast %55 : vector<8x8xbf16> to vector<1x8x8xbf16>
    %60 = vector.shape_cast %56 : vector<8x8xbf16> to vector<1x8x8xbf16>
    %61 = vector.shape_cast %57 : vector<8x8xbf16> to vector<1x8x8xbf16>
    %62 = tpu.concatenate %58, %59, %60, %61 in 0 : vector<1x8x8xbf16>, vector<1x8x8xbf16>, vector<1x8x8xbf16>, vector<1x8x8xbf16> -> vector<4x8x8xbf16>
    "tpu.trace_start"() <{level = 10 : i32, message = "hnd,hmd->hnm"}> : () -> ()
    %cst_19 = arith.constant dense<0.000000e+00> : vector<4x8x8xf32>
    %63 = tpu.matmul %42, %52, %cst_19 {dimension_numbers = #tpu.dot_dimension_numbers<[2], [2], [1], [1], [0, 0, 0, 1, 1, 1], [0], [0]>} : vector<4x8x8xbf16>, vector<4x8x8xbf16>, vector<4x8x8xf32> -> vector<4x8x8xf32>
    "tpu.trace_stop"() : () -> ()
    %cst_20 = arith.constant dense<0xFF800000> : vector<4x8xf32>
    %64 = vector.multi_reduction <maximumf>, %63, %cst_20 [2] : vector<4x8x8xf32> to vector<4x8xf32>
    %65 = vector.shape_cast %64 : vector<4x8xf32> to vector<4x8x1xf32>
    %66 = vector.broadcast %65 : vector<4x8x1xf32> to vector<4x8x8xf32>
    %67 = arith.subf %63, %66 : vector<4x8x8xf32>
    %68 = math.exp %67 : vector<4x8x8xf32>
    %cst_21 = arith.constant dense<0.000000e+00> : vector<4x8xf32>
    %69 = vector.multi_reduction <add>, %68, %cst_21 [2] : vector<4x8x8xf32> to vector<4x8xf32>
    %70 = vector.shape_cast %69 : vector<4x8xf32> to vector<4x8x1xf32>
    %71 = tpu.reciprocal %70 {approx = true} : vector<4x8x1xf32> -> vector<4x8x1xf32>
    %72 = vector.broadcast %71 : vector<4x8x1xf32> to vector<4x8x8xf32>
    %73 = arith.mulf %68, %72 : vector<4x8x8xf32>
    %74 = arith.truncf %73 : vector<4x8x8xf32> to vector<4x8x8xbf16>
    "tpu.trace_start"() <{level = 10 : i32, message = "hnm,hmd->hnd"}> : () -> ()
    %cst_22 = arith.constant dense<0.000000e+00> : vector<4x8x8xf32>
    %75 = tpu.matmul %74, %62, %cst_22 {dimension_numbers = #tpu.dot_dimension_numbers<[2], [1], [1], [2], [0, 0, 0, 1, 1, 2], [0], [0]>} : vector<4x8x8xbf16>, vector<4x8x8xbf16>, vector<4x8x8xf32> -> vector<4x8x8xf32>
    "tpu.trace_stop"() : () -> ()
    %76 = arith.truncf %75 : vector<4x8x8xf32> to vector<4x8x8xbf16>
    %c0_23 = arith.constant 0 : index
    %c0_24 = arith.constant 0 : index
    %c0_25 = arith.constant 0 : index
    %77 = vector.load %arg7[%c0_23, %c0_24, %c0_25] : memref<4x8x32xbf16, #tpu.memory_space<vmem>>, vector<4x8x32xbf16>
    "tpu.trace_start"() <{level = 10 : i32, message = "hnd,hdc->hnc"}> : () -> ()
    %cst_26 = arith.constant dense<0.000000e+00> : vector<4x8x32xf32>
    %78 = tpu.matmul %76, %77, %cst_26 {dimension_numbers = #tpu.dot_dimension_numbers<[2], [1], [1], [2], [0, 0, 0, 1, 1, 2], [0], [0]>} : vector<4x8x8xbf16>, vector<4x8x32xbf16>, vector<4x8x32xf32> -> vector<4x8x32xf32>
    "tpu.trace_stop"() : () -> ()
    %cst_27 = arith.constant dense<0.000000e+00> : vector<8x32xf32>
    %79 = vector.multi_reduction <add>, %78, %cst_27 [0] : vector<4x8x32xf32> to vector<8x32xf32>
    %c0_28 = arith.constant 0 : index
    %c0_29 = arith.constant 0 : index
    %80 = vector.load %arg8[%c0_28, %c0_29] : memref<1x32xf32, #tpu.memory_space<vmem>>, vector<1x32xf32>
    %81 = vector.broadcast %80 : vector<1x32xf32> to vector<8x32xf32>
    %82 = arith.addf %79, %81 : vector<8x32xf32>
    %83 = arith.addf %1, %82 : vector<8x32xf32>
    %c0_30 = arith.constant 0 : index
    %c0_31 = arith.constant 0 : index
    %84 = vector.load %arg9[%c0_30, %c0_31] : memref<1x32xf32, #tpu.memory_space<vmem>>, vector<1x32xf32>
    %c0_32 = arith.constant 0 : index
    %c0_33 = arith.constant 0 : index
    %85 = vector.load %arg10[%c0_32, %c0_33] : memref<1x32xf32, #tpu.memory_space<vmem>>, vector<1x32xf32>
    %cst_34 = arith.constant dense<0.000000e+00> : vector<8xf32>
    %86 = vector.multi_reduction <add>, %83, %cst_34 [1] : vector<8x32xf32> to vector<8xf32>
    %87 = vector.shape_cast %86 : vector<8xf32> to vector<8x1xf32>
    %cst_35 = arith.constant 3.200000e+01 : f32
    %88 = vector.broadcast %cst_35 : f32 to vector<8x1xf32>
    %89 = arith.divf %87, %88 : vector<8x1xf32>
    %90 = vector.broadcast %89 : vector<8x1xf32> to vector<8x32xf32>
    %91 = arith.subf %83, %90 : vector<8x32xf32>
    %92 = arith.mulf %91, %91 : vector<8x32xf32>
    %cst_36 = arith.constant dense<0.000000e+00> : vector<8xf32>
    %93 = vector.multi_reduction <add>, %92, %cst_36 [1] : vector<8x32xf32> to vector<8xf32>
    %94 = vector.shape_cast %93 : vector<8xf32> to vector<8x1xf32>
    %cst_37 = arith.constant 3.200000e+01 : f32
    %95 = vector.broadcast %cst_37 : f32 to vector<8x1xf32>
    %96 = arith.divf %94, %95 : vector<8x1xf32>
    %97 = vector.broadcast %89 : vector<8x1xf32> to vector<8x32xf32>
    %98 = arith.subf %83, %97 : vector<8x32xf32>
    %cst_38 = arith.constant 9.99999974E-6 : f32
    %99 = vector.broadcast %cst_38 : f32 to vector<8x1xf32>
    %100 = arith.addf %96, %99 : vector<8x1xf32>
    %101 = math.rsqrt %100 : vector<8x1xf32>
    %102 = vector.broadcast %101 : vector<8x1xf32> to vector<8x32xf32>
    %103 = arith.mulf %98, %102 : vector<8x32xf32>
    %104 = vector.broadcast %84 : vector<1x32xf32> to vector<8x32xf32>
    %105 = arith.mulf %103, %104 : vector<8x32xf32>
    %106 = vector.broadcast %85 : vector<1x32xf32> to vector<8x32xf32>
    %107 = arith.addf %105, %106 : vector<8x32xf32>
    %108 = arith.truncf %107 : vector<8x32xf32> to vector<8x32xbf16>
    %c0_39 = arith.constant 0 : index
    %c0_40 = arith.constant 0 : index
    %109 = vector.load %arg11[%c0_39, %c0_40] : memref<32x128xbf16, #tpu.memory_space<vmem>>, vector<32x128xbf16>
    %cst_41 = arith.constant dense<0.000000e+00> : vector<8x128xf32>
    %110 = tpu.matmul %108, %109, %cst_41 {dimension_numbers = #tpu.dot_dimension_numbers<[1], [0], [0], [1], [0, 0, 1, 1], [], []>} : vector<8x32xbf16>, vector<32x128xbf16>, vector<8x128xf32> -> vector<8x128xf32>
    %c0_42 = arith.constant 0 : index
    %c0_43 = arith.constant 0 : index
    %111 = vector.load %arg12[%c0_42, %c0_43] : memref<1x128xf32, #tpu.memory_space<vmem>>, vector<1x128xf32>
    %112 = vector.broadcast %111 : vector<1x128xf32> to vector<8x128xf32>
    %113 = arith.addf %110, %112 : vector<8x128xf32>
    %cst_44 = arith.constant 5.000000e-01 : f32
    %114 = vector.broadcast %cst_44 : f32 to vector<8x128xf32>
    %115 = arith.mulf %114, %113 : vector<8x128xf32>
    %cst_45 = arith.constant 0.707106769 : f32
    %116 = vector.broadcast %cst_45 : f32 to vector<8x128xf32>
    %117 = arith.mulf %113, %116 : vector<8x128xf32>
    %118 = math.absf %117 : vector<8x128xf32>
    %cst_46 = arith.constant 0.327591091 : f32
    %119 = vector.broadcast %cst_46 : f32 to vector<8x128xf32>
    %120 = arith.mulf %119, %118 : vector<8x128xf32>
    %cst_47 = arith.constant 1.000000e+00 : f32
    %121 = vector.broadcast %cst_47 : f32 to vector<8x128xf32>
    %122 = arith.addf %121, %120 : vector<8x128xf32>
    %cst_48 = arith.constant 1.000000e+00 : f32
    %123 = vector.broadcast %cst_48 : f32 to vector<8x128xf32>
    %124 = arith.divf %123, %122 : vector<8x128xf32>
    %cst_49 = arith.constant 1.06140542 : f32
    %125 = vector.broadcast %cst_49 : f32 to vector<8x128xf32>
    %126 = arith.mulf %125, %124 : vector<8x128xf32>
    %cst_50 = arith.constant -1.45315206 : f32
    %127 = vector.broadcast %cst_50 : f32 to vector<8x128xf32>
    %128 = arith.addf %126, %127 : vector<8x128xf32>
    %129 = arith.mulf %128, %124 : vector<8x128xf32>
    %cst_51 = arith.constant 1.42141378 : f32
    %130 = vector.broadcast %cst_51 : f32 to vector<8x128xf32>
    %131 = arith.addf %129, %130 : vector<8x128xf32>
    %132 = arith.mulf %131, %124 : vector<8x128xf32>
    %cst_52 = arith.constant -0.284496725 : f32
    %133 = vector.broadcast %cst_52 : f32 to vector<8x128xf32>
    %134 = arith.addf %132, %133 : vector<8x128xf32>
    %135 = arith.mulf %134, %124 : vector<8x128xf32>
    %cst_53 = arith.constant 0.254829586 : f32
    %136 = vector.broadcast %cst_53 : f32 to vector<8x128xf32>
    %137 = arith.addf %135, %136 : vector<8x128xf32>
    %138 = arith.mulf %137, %124 : vector<8x128xf32>
    %cst_54 = arith.constant 0.000000e+00 : f32
    %139 = vector.broadcast %cst_54 : f32 to vector<8x128xf32>
    %140 = arith.subf %139, %118 : vector<8x128xf32>
    %141 = arith.mulf %140, %118 : vector<8x128xf32>
    %142 = math.exp %141 : vector<8x128xf32>
    %143 = arith.mulf %138, %142 : vector<8x128xf32>
    %cst_55 = arith.constant 1.000000e+00 : f32
    %144 = vector.broadcast %cst_55 : f32 to vector<8x128xf32>
    %145 = arith.subf %144, %143 : vector<8x128xf32>
    %cst_56 = arith.constant 0.000000e+00 : f32
    %146 = vector.broadcast %cst_56 : f32 to vector<8x128xf32>
    %147 = arith.cmpf olt, %117, %146 : vector<8x128xf32>
    %cst_57 = arith.constant 0.000000e+00 : f32
    %148 = vector.broadcast %cst_57 : f32 to vector<8x128xf32>
    %149 = arith.subf %148, %145 : vector<8x128xf32>
    %150 = arith.select %147, %149, %145 : vector<8x128xi1>, vector<8x128xf32>
    %cst_58 = arith.constant 1.000000e+00 : f32
    %151 = vector.broadcast %cst_58 : f32 to vector<8x128xf32>
    %152 = arith.addf %151, %150 : vector<8x128xf32>
    %153 = arith.mulf %115, %152 : vector<8x128xf32>
    %154 = arith.truncf %153 : vector<8x128xf32> to vector<8x128xbf16>
    %c0_59 = arith.constant 0 : index
    %c0_60 = arith.constant 0 : index
    %155 = vector.load %arg13[%c0_59, %c0_60] : memref<128x32xbf16, #tpu.memory_space<vmem>>, vector<128x32xbf16>
    %cst_61 = arith.constant dense<0.000000e+00> : vector<8x32xf32>
    %156 = tpu.matmul %154, %155, %cst_61 {dimension_numbers = #tpu.dot_dimension_numbers<[1], [0], [0], [1], [0, 0, 1, 1], [], []>} : vector<8x128xbf16>, vector<128x32xbf16>, vector<8x32xf32> -> vector<8x32xf32>
    %c0_62 = arith.constant 0 : index
    %c0_63 = arith.constant 0 : index
    %157 = vector.load %arg14[%c0_62, %c0_63] : memref<1x32xf32, #tpu.memory_space<vmem>>, vector<1x32xf32>
    %158 = vector.broadcast %157 : vector<1x32xf32> to vector<8x32xf32>
    %159 = arith.addf %156, %158 : vector<8x32xf32>
    %160 = arith.addf %83, %159 : vector<8x32xf32>
    %c0_64 = arith.constant 0 : index
    %c0_65 = arith.constant 0 : index
    %c0_66 = arith.constant 0 : index
    %161 = vector.load %arg15[%c0_64, %c0_65, %c0_66] : memref<1x8x32xf32, #tpu.memory_space<vmem>>, vector<1x8x32xf32>
    %162 = vector.shape_cast %161 : vector<1x8x32xf32> to vector<8x32xf32>
    %163 = vector.shape_cast %160 : vector<8x32xf32> to vector<1x8x32xf32>
    tpu.vector_store %arg15[%c0_64, %c0_65, %c0_66], %163 {strides = array<i32>} : memref<1x8x32xf32, #tpu.memory_space<vmem>>, vector<1x8x32xf32>,
    return
  }
  func.func @transform_0(%arg0: i32) -> (i32, i32, i32) {
    %c0_i32 = arith.constant 0 : i32
    %c0_i32_0 = arith.constant 0 : i32
    %c0_i32_1 = arith.constant 0 : i32
    return %arg0, %c0_i32, %c0_i32_0 : i32, i32, i32
  }
  func.func @transform_1(%arg0: i32) -> (i32, i32) {
    %c0_i32 = arith.constant 0 : i32
    %c0_i32_0 = arith.constant 0 : i32
    %c0_i32_1 = arith.constant 0 : i32
    return %c0_i32, %c0_i32_0 : i32, i32
  }
  func.func @transform_2(%arg0: i32) -> (i32, i32) {
    %c0_i32 = arith.constant 0 : i32
    %c0_i32_0 = arith.constant 0 : i32
    %c0_i32_1 = arith.constant 0 : i32
    return %c0_i32, %c0_i32_0 : i32, i32
  }
  func.func @transform_3(%arg0: i32) -> (i32, i32) {
    %c0_i32 = arith.constant 0 : i32
    %c0_i32_0 = arith.constant 0 : i32
    %c0_i32_1 = arith.constant 0 : i32
    return %c0_i32, %c0_i32_0 : i32, i32
  }
  func.func @transform_4(%arg0: i32) -> (i32, i32) {
    %c0_i32 = arith.constant 0 : i32
    %c0_i32_0 = arith.constant 0 : i32
    %c0_i32_1 = arith.constant 0 : i32
    return %c0_i32, %c0_i32_0 : i32, i32
  }
  func.func @transform_5(%arg0: i32) -> (i32, i32) {
    %c0_i32 = arith.constant 0 : i32
    %c0_i32_0 = arith.constant 0 : i32
    %c0_i32_1 = arith.constant 0 : i32
    return %c0_i32, %c0_i32_0 : i32, i32
  }
  func.func @transform_6(%arg0: i32) -> (i32, i32, i32) {
    %c0_i32 = arith.constant 0 : i32
    %c0_i32_0 = arith.constant 0 : i32
    %c0_i32_1 = arith.constant 0 : i32
    %c0_i32_2 = arith.constant 0 : i32
    return %c0_i32, %c0_i32_0, %c0_i32_1 : i32, i32, i32
  }
  func.func @transform_7(%arg0: i32) -> (i32, i32) {
    %c0_i32 = arith.constant 0 : i32
    %c0_i32_0 = arith.constant 0 : i32
    %c0_i32_1 = arith.constant 0 : i32
    return %c0_i32, %c0_i32_0 : i32, i32
  }
  func.func @transform_8(%arg0: i32) -> (i32, i32) {
    %c0_i32 = arith.constant 0 : i32
    %c0_i32_0 = arith.constant 0 : i32
    %c0_i32_1 = arith.constant 0 : i32
    return %c0_i32, %c0_i32_0 : i32, i32
  }
  func.func @transform_9(%arg0: i32) -> (i32, i32) {
    %c0_i32 = arith.constant 0 : i32
    %c0_i32_0 = arith.constant 0 : i32
    %c0_i32_1 = arith.constant 0 : i32
    return %c0_i32, %c0_i32_0 : i32, i32
  }
  func.func @transform_10(%arg0: i32) -> (i32, i32) {
    %c0_i32 = arith.constant 0 : i32
    %c0_i32_0 = arith.constant 0 : i32
    %c0_i32_1 = arith.constant 0 : i32
    return %c0_i32, %c0_i32_0 : i32, i32
  }
  func.func @transform_11(%arg0: i32) -> (i32, i32) {
    %c0_i32 = arith.constant 0 : i32
    %c0_i32_0 = arith.constant 0 : i32
    %c0_i32_1 = arith.constant 0 : i32
    return %c0_i32, %c0_i32_0 : i32, i32
  }
  func.func @transform_12(%arg0: i32) -> (i32, i32) {
    %c0_i32 = arith.constant 0 : i32
    %c0_i32_0 = arith.constant 0 : i32
    %c0_i32_1 = arith.constant 0 : i32
    return %c0_i32, %c0_i32_0 : i32, i32
  }
  func.func @transform_13(%arg0: i32) -> (i32, i32) {
    %c0_i32 = arith.constant 0 : i32
    %c0_i32_0 = arith.constant 0 : i32
    %c0_i32_1 = arith.constant 0 : i32
    return %c0_i32, %c0_i32_0 : i32, i32
  }
  func.func @transform_14(%arg0: i32) -> (i32, i32, i32) {
    %c0_i32 = arith.constant 0 : i32
    %c0_i32_0 = arith.constant 0 : i32
    %c0_i32_1 = arith.constant 0 : i32
    return %arg0, %c0_i32, %c0_i32_0 : i32, i32, i32
  }
}

</mosaic_0001>

<bundles_post_ra>
// kernel: tpu_custom_call.1
= control target key start
LH: loop header
LB: loop body
LE: loop exit
PB: predicated region body
PF: predicated region fallthrough
CT: control target
= control target key end

     0   :  { %s1923_s0 = inlined_call_operand.vmem [shape: f32[2,8,32], index: 0, kind: input, shape index: {}]   ;;  %s1924_s1 = inlined_call_operand.hbm [shape: f32[1,32], index: 1, kind: input, shape index: {}]   ;;  %s1925_s2 = inlined_call_operand.vmem [shape: f32[1,32], index: 2, kind: input, shape index: {}]   ;;  %s1926_s3 = inlined_call_operand.vmem [shape: bf16[32,32], index: 3, kind: input, shape index: {}]   ;;  %s1927_s4 = inlined_call_operand.vmem [shape: bf16[32,32], index: 4, kind: input, shape index: {}]   ;;  %s1928_s5 = inlined_call_operand.vmem [shape: bf16[32,32], index: 5, kind: input, shape index: {}]   ;;  %s1929_s6 = inlined_call_operand.vmem [shape: bf16[4,8,32], index: 6, kind: input, shape index: {}]   ;;  %s1930_s7 = inlined_call_operand.vmem [shape: f32[1,32], index: 7, kind: input, shape index: {}]   ;;  %s1931_s8 = inlined_call_operand.vmem [shape: f32[1,32], index: 8, kind: input, shape index: {}]   ;;  %s1932_s9 = inlined_call_operand.vmem [shape: f32[1,32], index: 9, kind: input, shape index: {}]   ;;  %s1933_s10 = inlined_call_operand.hbm [shape: bf16[32,128], index: 10, kind: input, shape index: {}]   ;;  %s1934_s11 = inlined_call_operand.vmem [shape: f32[1,128], index: 11, kind: input, shape index: {}]   ;;  %s1935_s12 = inlined_call_operand.vmem [shape: bf16[128,32], index: 12, kind: input, shape index: {}]   ;;  %s1936_s13 = inlined_call_operand.vmem [shape: f32[1,32], index: 13, kind: input, shape index: {}]   ;;  %s1937_s14 = inlined_call_operand.hbm [shape: f32[2,8,32], index: 14, kind: output, shape index: {}]  }
   0x1   :  { %1942 = sst [smem:[#allocation15_spill]] %s1923_s0 }
   0x2   :  { %19 = vsyncpa [#allocation3], 0 }
   0x3   :  { %20 = vsyncpa [#allocation6], 0 }
   0x4   :  { %21 = vsyncpa [#allocation4], 0 }
   0x5   :  { %23 = vsyncpa [#allocation4 + $0x1], 0  ;;  %s1665_s29 = smov 0   ;;  %s1667_s30 = smov 0  }
   0x6   :  { %s1669_s15 = smov 0   ;;  %s1671_s16 = smov 0  }
   0x7 LB: > { %1943 = sst [smem:[#allocation11_spill]] %s1576_s15  ;;  %s1686_s17 = sadd.s32 4294967295, %s1580_s16   ;;  %s1580_s16 = sphi %s1671_s16, %s1952_s16   ;;  %s1576_s15 = sphi %s1669_s15, %s1954_s15   ;;  %s1572_s30 = sphi %s1667_s30, %s1956_s30   ;;  %s1568_s29 = sphi %s1665_s29, %s1955_s29  }
   0x8   : > { %s1241_s18 = sadd.s32 4294967294, %s1580_s16   ;;  %s1690_s19 = sadd.s32 1, %s1580_s16  }
   0x9   : > { %1944 = sst [smem:[#allocation12_spill]] %s1690_s19  ;;  %s335_s20 = sadd.s32 1, %s1576_s15 }
   0xa   : > { %s332_s21 = ssub.s32 %s1580_s16, %s1690_s19  ;;  %p345_p0 = scmp.ne.s32.totalorder %s1576_s15, %s1572_s30 }
   0xb   : > { %p333_p1 = scmp.eq.s32.totalorder %s332_s21, 0  ;;  %p346_p2 = scmp.eq.s32.totalorder %s1686_s17, 1 }
   0xc   : > { %p351_p3 = scmp.ne.s32.totalorder %s1572_s30, %s1568_s29  ;;  %p352_p4 = scmp.eq.s32.totalorder %s1241_s18, 1 }
   0xd   : > { %s1701_s22 = scalar_select %p333_p1, %s1576_s15, %s335_s20  }
   0xe   : > { %p1703_p5 = por %p346_p2, %p345_p0  ;;  %p1707_p6 = por %p352_p4, %p351_p3 }
   0xf   : > { %1945 = sst [smem:[#allocation13_spill]] %s1701_s22  ;;  %p1242_p7 = scmp.ge.s32.totalorder %s1580_s16, 1 }
  0x10   : > { %s1947_s24 = scalar_select %p1707_p6, 1, 0 }
  0x11   : > { %p359_p8 = scmp.lt.s32.totalorder %s1580_s16, 3  ;;  %p1372_p9 = scmp.eq.s32.totalorder %s1686_s17, 0 }
  0x12   : > { %1948 = sst [smem:[#allocation14_spill]] %s1947_s24  ;;  %s371_s28 = sshll.u32 %s1924_s1, 4  ;;  %s372_s28 = int_to_ptr.hbm [resolvable:$true] %s371_s28 }
  0x13   : > { %p1714_p10 = pnand %p1242_p7, %p359_p8  ;;  %s1582_s18 = smov [#allocation2]  }
  0x14   : > { %s373_s20 = sshll.u32 %s1582_s18, 4  ;;  %s406_s15 = sshll.u32 %s1933_s10, 4  ;;  %s374_s20 = int_to_ptr.vmem [resolvable:$true] %s373_s20  ;;  %s407_s15 = int_to_ptr.hbm [resolvable:$true] %s406_s15 }
  0x15   : > { %p1361_p11 = pneg %p1714_p10  ;;  %s1583_s19 = smov [#allocation5]  }
  0x16   : > { %s408_s24 = sshll.u32 %s1583_s19, 4  ;;  %s1584_s26 = smov 64   ;;  %s409_s24 = int_to_ptr.vmem [resolvable:$true] %s408_s24 }
  0x17   : > { %p1362_p12 = pnand %p1372_p9, %p1361_p11  ;;  %s1585_s27 = smov 4  }
  0x18   : > { %440 = sbr.rel (%p1714_p10) target bundleno = 1841 (0x731), region = 76 }
  0x19   : > { %1364 = dma.hbm_to_vmem [thread:$0]  (!%p1362_p12), %s372_s28, 16, %s374_s20, [#allocation3]  }
  0x1a   : > { %1367 = dma.hbm_to_vmem [thread:$0]  (!%p1362_p12), %s407_s15, 256, %s409_s24, [#allocation6], %s1584_s26, %s1584_s26, %s1585_s27  }
  0x1d   : > { %1555 = dma.done.wait (%p1372_p9), [#allocation3], 16  }
  0x1e   : > { %1557 = vsyncadd (%p1372_p9), [#allocation3], 4294967280 }
  0x1f   : > { %1559 = dma.done.wait (%p1372_p9), [#allocation6], 256  }
  0x20   : > { %1561 = vsyncadd (%p1372_p9), [#allocation6], 4294967040  ;;  %p491_p13 = scmp.lt.s32.totalorder %s1686_s17, 1  ;;  %s1950_s0 = sld [smem:[#allocation15_spill]]  ;;  %vm499_vm0 = vcmask 261120   ;;  %v1586_v2 = vmov 32.0  }
  0x21   : > { %1424 = vrcp.f32 %v1586_v2  ;;  %v1336_v14 = vld [vmem:[%s1926_s3 + $0x8] sm:$0xff]  ;;  %v1335_v16 = vld [vmem:[%s1926_s3] sm:$0xff]  ;;  %s1587_s21 = smov 120   ;;  %vm652_vm5 = vcmask 64512   ;;  %vm780_vm6 = vcmask 1043456   ;;  %s1588_s26 = smov 104  }
  0x22   : > { %s492_s19 = scalar_select %p491_p13, %s1686_s17, 1  ;;  %v1340_v15 = vld [vmem:[%s1928_s5 + $0x8] sm:$0xff]  ;;  %563 = vmatpush.bf16.msra.mxu1 %v1336_v14  ;;  %v1339_v17 = vld [vmem:[%s1928_s5] sm:$0xff] }
  0x23   : > { %621 = vmatpush.bf16.msra.mxu2 %v1340_v15  ;;  %v1338_v18 = vld [vmem:[%s1927_s4 + $0x8] sm:$0xff]  ;;  %v1337_v21 = vld [vmem:[%s1927_s4] sm:$0xff]  ;;  %s1589_s27 = smov 112  }
  0x24   : > { %s1250_s15 = sshll.u32 %s492_s19, 3  ;;  %v1417_v29 = vld [vmem:[#allocation2] ss:$0 sm:$0xff] }
  0x25   : > { %v1418_v32 = vld [vmem:[%s1925_s2] ss:$0 sm:$0xff] }
  0x26   : > { %s494_s25 = scalar_lea.vmem %s1950_s0, %s1250_s15  ;;  %564 = vmatpush.bf16.msra.mxu1 %v1335_v16  ;;  %s1332_s15 = sshll.u32 %s1686_s17, 3 }
  0x27   : > { %v1743_v0 = vld [vmem:[%s494_s25] sm:$0xff]  ;;  %v1425_v3 = vpop.eup %1424  ;;  %622 = vmatpush.bf16.msra.mxu2 %v1339_v17  ;;  %s1155_s18 = scalar_lea.hbm %s1937_s14, %s1332_s15 }
  0x28   : > { %v500_v1 = vsel %vm499_vm0, %v1743_v0, 0.0  ;;  %v504_v4 = vmul.f32 32.0, %v1425_v3  ;;  %vm508_vm1 = vweird.f32 %v1425_v3 }
  0x29   : > { %501 = vadd.xlane.f32.xlu0 %v500_v1 }
  0x2a   : > { %v505_v5 = vsub.f32 1.0, %v504_v4  ;;  %592 = vmatpush.bf16.msrb.mxu1 %v1338_v18 }
  0x2c   : > { %v506_v6 = vmul.f32 %v1425_v3, %v505_v5 }
  0x2e   : > { %v507_v7 = vadd.f32 %v1425_v3, %v506_v6  ;;  %593 = vmatpush.bf16.msrb.mxu1 %v1337_v21 }
  0x30   : > { %v1747_v8 = vsel %vm508_vm1, %v1425_v3, %v507_v7 }
  0x9c   : > { %v502_v9 = vpop.xlane.xlu0 %501 }
  0x9d   : > { %v510_v10 = vmul.f32 %v1747_v8, %v502_v9 }
  0x9f   : > { %v511_v11 = vsub.f32 %v1743_v0, %v510_v10 }
  0xa1   : > { %v512_v12 = vmul.f32 %v511_v11, %v511_v11 }
  0xa3   : > { %v513_v13 = vsel %vm499_vm0, %v512_v12, 0.0 }
  0xa4   : > { %514 = vadd.xlane.f32.xlu0 %v513_v13 }
 0x117   : > { %v515_v19 = vpop.xlane.xlu0 %514 }
 0x118   : > { %v516_v20 = vmul.f32 %v515_v19, %v1747_v8 }
 0x11a   : > { %v517_v22 = vadd.f32 1e-05, %v516_v20 }
 0x11c   : > { %1426 = vrsqrt.f32 %v517_v22  ;;  %vm524_vm3 = vweird.f32 %v517_v22 }
 0x122   : > { %v1427_v23 = vpop.eup %1426 }
 0x123   : > { %v519_v24 = vmul.f32 %v1427_v23, %v517_v22  ;;  %vm525_vm2 = vweird.f32 %v1427_v23 }
 0x124   : > { %vm526_vm4 = vmor %vm524_vm3, %vm525_vm2 }
 0x125   : > { %v520_v25 = vmul.f32 %v1427_v23, %v519_v24 }
 0x127   : > { %v521_v26 = vmul.f32 0.5, %v520_v25 }
 0x129   : > { %v522_v27 = vsub.f32 1.5, %v521_v26 }
 0x12b   : > { %v523_v28 = vmul.f32 %v1427_v23, %v522_v27 }
 0x12d   : > { %v527_v30 = vsel %vm526_vm4, %v1427_v23, %v523_v28 }
 0x12e   : > { %v528_v31 = vmul.f32 %v527_v30, %v511_v11 }
 0x130   : > { %v532_v33 = vmul.f32 %v1417_v29, %v528_v31 }
 0x132   : > { %v536_v34 = vadd.f32 %v1418_v32, %v532_v33  ;;  %v858_v33 = vld [vmem:[%s1929_s6] sm:$0xf] }
 0x134   : > { %v537_v35 = vpack.c.bf16 %v536_v34, %v536_v34  ;;  %v866_v34 = vsel %vm780_vm6, %v858_v33, 0 }
 0x136   : > { %1259 = vmatmul.msk.bf16.vlgmr.msra.gmra.mxu1 %vm499_vm0, %v537_v35  ;;  %1277 = vmatmul.msk.bf16.vlgmr.msra.gmra.mxu2 %vm499_vm0, %v537_v35 }
 0x146   : > { %1268 = vmatmul.msk.bf16.vlgmr.msrb.gmra.mxu1 %vm499_vm0, %v537_v35 }
 0x1b3   : > { %v566_v36 = vpop.f32.mrf.mxu1 }
 0x1b4   : > { %v628_v37 = vpack.c.bf16 %v566_v36, %v566_v36 }
 0x1b6   : > { %630 = vrot.lane.b32.xlu0 %v628_v37, %s1587_s21 }
 0x1b9   : > { %v624_v38 = vpop.f32.mrf.mxu2 }
 0x1ba   : > { %v1778_v41 = vpack.c.bf16 %v624_v38, %v624_v38 }
 0x1bb   : > { %v568_v39 = vpop.f32.mrf.mxu1 }
 0x1bc   : > { %v782_v45 = vsel %vm780_vm6, %v1778_v41, 0 }
 0x1c1   : > { %v626_v40 = vpop.f32.mrf.mxu2 }
 0x1c3   : > { %v595_v42 = vpop.f32.mrf.mxu1 }
 0x1c4   : > { %v636_v43 = vpack.c.bf16 %v595_v42, %v595_v42 }
 0x1c6   : > { %638 = vrot.lane.b32.xlu2 %v636_v43, %s1587_s21  ;;  %642 = vrot.lane.b32.xlu1 %v636_v43, %s1588_s26  ;;  %v657_v44 = vsel %vm652_vm5, %v636_v43, 0 }
 0x1c7   : > { %666 = vmatpush.bf16.xpose.msra.mxu3 %v657_v44 }
 0x1cb   : > { %v597_v46 = vpop.f32.mrf.mxu1 }
 0x1ce   : > { %640 = vrot.lane.b32.xlu2 %v636_v43, %s1589_s27  ;;  %634 = vrot.lane.b32.xlu1 %v628_v37, %s1588_s26 }
 0x1cf   : > { %791 = vmatpush.bf16.msrb.mxu3 %v782_v45 }
 0x1d0   : > { %1278 = vmatmul.msk.bf16.vlgmr.msra.gmra.mxu3 %vm652_vm5, %v628_v37 }
 0x1d3   : > { %875 = vmatpush.bf16.msra.mxu3 %v866_v34 }
 0x1d6   : > { %632 = vrot.lane.b32.xlu1 %v628_v37, %s1589_s27 }
 0x220   : > { %v639_v47 = vpop.permute.xlu2 %638 }
 0x221   : > { %v676_v48 = vsel %vm652_vm5, %v639_v47, 0 }
 0x222   : > { %685 = vmatpush.bf16.xpose.msra.mxu0 %v676_v48 }
 0x228   : > { %v631_v49 = vpop.permute.xlu0 %630  ;;  %v641_v50 = vpop.permute.xlu2 %640 }
 0x229   : > { %v695_v51 = vsel %vm652_vm5, %v641_v50, 0  ;;  %1279 = vmatmul.msk.bf16.vlgmr.msra.gmra.mxu0 %vm652_vm5, %v631_v49 }
 0x22a   : > { %704 = vmatpush.bf16.xpose.msra.mxu1 %v695_v51 }
 0x238   : > { %v643_v52 = vpop.permute.xlu1 %642 }
 0x239   : > { %v714_v53 = vsel %vm652_vm5, %v643_v52, 0 }
 0x23a   : > { %723 = vmatpush.bf16.xpose.msrb.mxu2 %v714_v53  ;;  %v861_v53 = vld [vmem:[%s1929_s6 + $0xc] sm:$0xf] }
 0x240   : > { %v635_v54 = vpop.permute.xlu1 %634 }
 0x241   : > { %1281 = vmatmul.msk.bf16.vlgmr.msrb.gmra.mxu2 %vm652_vm5, %v635_v54  ;;  %v923_v54 = vsel %vm780_vm6, %v861_v53, 0 }
 0x248   : > { %v633_v55 = vpop.permute.xlu1 %632 }
 0x249   : > { %1280 = vmatmul.msk.bf16.vlgmr.msra.gmra.mxu1 %vm652_vm5, %v633_v55  ;;  %v860_v55 = vld [vmem:[%s1929_s6 + $0x8] sm:$0xf] }
 0x253   : > { %v668_v56 = vpop.f32.mrf.mxu3 }
 0x254   : > { %v729_v57 = vsel %vm652_vm5, %v668_v56, -inf }
 0x255   : > { %730 = vmax.xlane.f32.xlu2 %v729_v57  ;;  %v859_v57 = vld [vmem:[%s1929_s6 + $0x4] sm:$0xf] }
 0x25b   : > { %v670_v58 = vpop.f32.mrf.mxu3 }
 0x25c   : > { %v885_v58 = vsel %vm780_vm6, %v859_v57, 0 }
 0x2a6   : > { %v687_v59 = vpop.f32.mrf.mxu0 }
 0x2a7   : > { %v732_v60 = vsel %vm652_vm5, %v687_v59, -inf }
 0x2a8   : > { %733 = vmax.xlane.f32.xlu0 %v732_v60 }
 0x2ae   : > { %v689_v61 = vpop.f32.mrf.mxu0 }
 0x2c4   : > { %v725_v62 = vpop.f32.mrf.mxu2 }
 0x2c5   : > { %v738_v63 = vsel %vm652_vm5, %v725_v62, -inf }
 0x2c6   : > { %739 = vmax.xlane.f32.xlu1 %v738_v63  ;;  %v706_v1 = vpop.f32.mrf.mxu1 }
 0x2c7   : > { %v735_v3 = vsel %vm652_vm5, %v706_v1, -inf }
 0x2c8   : > { %v731_v2 = vpop.xlane.xlu2 %730  ;;  %736 = vmax.xlane.f32.xlu2 %v735_v3 }
 0x2c9   : > { %v741_v4 = vsub.f32 %v668_v56, %v731_v2  ;;  %v904_v56 = vsel %vm780_vm6, %v860_v55, 0  ;;  %v1347_v55 = vld [vmem:[%s1935_s12 + $0x20] sm:$0xff] }
 0x2cb   : > { %v745_v5 = vmul.f32 1.442695, %v741_v4 }
 0x2cc   : > { %v727_v6 = vpop.f32.mrf.mxu2 }
 0x2cd   : > { %1428 = vpow2.f32 %v745_v5 }
 0x2ce   : > { %v708_v7 = vpop.f32.mrf.mxu1 }
 0x2d3   : > { %v1429_v9 = vpop.eup %1428 }
 0x2d4   : > { %v753_v10 = vsel %vm652_vm5, %v1429_v9, 0.0 }
 0x2d5   : > { %754 = vadd.xlane.f32.xlu2 %v753_v10 }
 0x2ed   : > { %650 = vrot.lane.b32.xlu2 %v1778_v41, %s1588_s26  ;;  %s1159_s26 = sshll.u32 %s1155_s18, 4  ;;  %s1160_s26 = int_to_ptr.hbm [resolvable:$true] %s1159_s26 }
 0x2ee   : > { %s1524_s0 = sshra.s32 %s1160_s26, 4  ;;  %s1525_s0 = int_to_ptr.hbm [resolvable:$true] %s1524_s0 }
 0x2ef   : > { %s1526_s22 = scalar_lea.hbm %s1525_s0, 8  ;;  %p1531_p3 = scmp.lt.s32.totalorder %s1525_s0, %s1937_s14 }
 0x2f0   : > { %p1527_p0 = scmp.ne.s32.totalorder %s1525_s0, %s1526_s22 }
 0x2f2   : > { %p1528_p1 = pnand %p1527_p0, %p1703_p5 }
 0x2f4   : > { %p1529_p2 = pneg %p1528_p1 }
 0x31b   : > { %v734_v11 = vpop.xlane.xlu0 %733 }
 0x31c   : > { %v742_v12 = vsub.f32 %v687_v59, %v734_v11 }
 0x31e   : > { %v747_v13 = vmul.f32 1.442695, %v742_v12 }
 0x320   : > { %1430 = vpow2.f32 %v747_v13 }
 0x326   : > { %v1431_v14 = vpop.eup %1430 }
 0x327   : > { %v756_v15 = vsel %vm652_vm5, %v1431_v14, 0.0 }
 0x328   : > { %757 = vadd.xlane.f32.xlu1 %v756_v15 }
 0x339   : > { %v740_v16 = vpop.xlane.xlu1 %739 }
 0x33a   : > { %v744_v17 = vsub.f32 %v725_v62, %v740_v16 }
 0x33b   : > { %v737_v18 = vpop.xlane.xlu2 %736 }
 0x33c   : > { %v751_v19 = vmul.f32 1.442695, %v744_v17  ;;  %v743_v20 = vsub.f32 %v706_v1, %v737_v18  ;;  %v1419_v17 = vld [vmem:[%s1930_s7] ss:$0 sm:$0xff] }
 0x33e   : > { %1432 = vpow2.f32 %v751_v19  ;;  %v749_v21 = vmul.f32 1.442695, %v743_v20 }
 0x340   : > { %1434 = vpow2.f32 %v749_v21 }
 0x344   : > { %v1433_v22 = vpop.eup %1432 }
 0x345   : > { %v762_v23 = vsel %vm652_vm5, %v1433_v22, 0.0 }
 0x346   : > { %v1435_v24 = vpop.eup %1434  ;;  %763 = vadd.xlane.f32.xlu1 %v762_v23 }
 0x347   : > { %v759_v26 = vsel %vm652_vm5, %v1435_v24, 0.0 }
 0x348   : > { %v755_v25 = vpop.xlane.xlu2 %754  ;;  %760 = vadd.xlane.f32.xlu0 %v759_v26 }
 0x349   : > { %1436 = vrcp.f32 %v755_v25 }
 0x34f   : > { %v1437_v27 = vpop.eup %1436 }
 0x350   : > { %v769_v28 = vmul.f32 %v1437_v27, %v1429_v9  ;;  %v651_v29 = vpop.permute.xlu2 %650 }
 0x351   : > { %v839_v30 = vsel %vm780_vm6, %v651_v29, 0 }
 0x352   : > { %848 = vmatpush.bf16.msra.mxu2 %v839_v30  ;;  %v773_v31 = vpack.c.bf16 %v769_v28, %v769_v28  ;;  %v1342_v30 = vld [vmem:[#allocation5 + $0x8] sm:$0xff] }
 0x354   : > { %1282 = vmatmul.msk.bf16.vlgmr.msrb.gmra.mxu3 %vm652_vm5, %v773_v31  ;;  %v1341_v31 = vld [vmem:[#allocation5] sm:$0xff] }
 0x355   : > { %1013 = vmatpush.bf16.msrb.mxu3 %v1342_v30 }
 0x356   : > { %932 = vmatpush.bf16.msrb.mxu2 %v923_v54 }
 0x359   : > { %1014 = vmatpush.bf16.msrb.mxu3 %v1341_v31 }
 0x35c   : > { %648 = vrot.lane.b32.xlu0 %v1778_v41, %s1589_s27  ;;  %s488_s27 = sand.u32 1, %s1572_s30  }
 0x35d   : > { %s1249_s19 = sshll.u32 %s488_s27, 3  ;;  %s1145_s17 = scalar_lea.sflag [#allocation4], %s488_s27 }
 0x35e   : > { %s490_s20 = scalar_lea.vmem [#allocation7], %s1249_s19  ;;  %s1530_s19 = scalar_lea.hbm %s1937_s14, 16 }
 0x35f   : > { %646 = vrot.lane.b32.xlu1 %v1778_v41, %s1587_s21  ;;  %s1157_s21 = sshll.u32 %s490_s20, 4  ;;  %p1532_p4 = scmp.lt.s32.totalorder %s1530_s19, %s1526_s22  ;;  %s1158_s21 = int_to_ptr.vmem [resolvable:$true] %s1157_s21 }
 0x361   : > { %p1533_p7 = por %p1532_p4, %p1531_p3 }
 0x363   : > { %p1534_p8 = pnand %p1533_p7, %p1529_p2 }
 0x39b   : > { %v758_v32 = vpop.xlane.xlu1 %757 }
 0x3b9   : > { %v764_v35 = vpop.xlane.xlu1 %763 }
 0x3ba   : > { %1438 = vrcp.f32 %v764_v35 }
 0x3bb   : > { %v761_v38 = vpop.xlane.xlu0 %760 }
 0x3bc   : > { %1440 = vrcp.f32 %v761_v38 }
 0x3bd   : > { %1442 = vrcp.f32 %v758_v32 }
 0x3c0   : > { %v1439_v36 = vpop.eup %1438 }
 0x3c1   : > { %v772_v37 = vmul.f32 %v1439_v36, %v1433_v22 }
 0x3c2   : > { %v1441_v40 = vpop.eup %1440 }
 0x3c3   : > { %v776_v39 = vpack.c.bf16 %v772_v37, %v772_v37  ;;  %v1443_v41 = vpop.eup %1442  ;;  %v771_v42 = vmul.f32 %v1441_v40, %v1435_v24  ;;  %v1420_v40 = vld [vmem:[%s1931_s8] ss:$0 sm:$0xff] }
 0x3c4   : > { %v770_v45 = vmul.f32 %v1443_v41, %v1431_v14 }
 0x3c5   : > { %1285 = vmatmul.msk.bf16.vlgmr.msra.gmra.mxu2 %vm652_vm5, %v776_v39  ;;  %v775_v46 = vpack.c.bf16 %v771_v42, %v771_v42 }
 0x3c6   : > { %v774_v49 = vpack.c.bf16 %v770_v45, %v770_v45 }
 0x3ce   : > { %v649_v43 = vpop.permute.xlu0 %648 }
 0x3cf   : > { %v820_v44 = vsel %vm780_vm6, %v649_v43, 0 }
 0x3d0   : > { %829 = vmatpush.bf16.msrb.mxu1 %v820_v44 }
 0x3d1   : > { %v647_v47 = vpop.permute.xlu1 %646 }
 0x3d2   : > { %v801_v48 = vsel %vm780_vm6, %v647_v47, 0  ;;  %v1422_v47 = vld [vmem:[%s1934_s11] ss:$0 sm:$0xff] }
 0x3d3   : > { %810 = vmatpush.bf16.msrb.mxu0 %v801_v48  ;;  %1284 = vmatmul.msk.bf16.vlgmr.msrb.gmra.mxu1 %vm652_vm5, %v775_v46  ;;  %v1350_v46 = vld [vmem:[%s1935_s12 + $0x38] sm:$0xff]  ;;  %v1349_v48 = vld [vmem:[%s1935_s12 + $0x30] sm:$0xff] }
 0x3d4   : > { %913 = vmatpush.bf16.msra.mxu1 %v904_v56 }
 0x3d6   : > { %1283 = vmatmul.msk.bf16.vlgmr.msrb.gmra.mxu0 %vm652_vm5, %v774_v49 }
 0x3d7   : > { %v793_v50 = vpop.f32.mrf.mxu3  ;;  %894 = vmatpush.bf16.msra.mxu0 %v885_v58  ;;  %v1346_v58 = vld [vmem:[%s1935_s12 + $0x18] sm:$0xff] }
 0x3d8   : > { %v854_v51 = vpack.c.bf16 %v793_v50, %v793_v50 }
 0x3da   : > { %1286 = vmatmul.msk.bf16.vlgmr.msra.gmra.mxu3 %vm652_vm5, %v854_v51 }
 0x3db   : > { %1129 = vmatpush.bf16.msrb.mxu0 %v1350_v46 }
 0x3df   : > { %v795_v52 = vpop.f32.mrf.mxu3  ;;  %1130 = vmatpush.bf16.msrb.mxu0 %v1349_v48 }
 0x3e0   : > { %v1348_v52 = vld [vmem:[%s1935_s12 + $0x28] sm:$0xff] }
 0x3e3   : > { %1131 = vmatpush.bf16.msrb.mxu0 %v1348_v52 }
 0x3e7   : > { %1132 = vmatpush.bf16.msrb.mxu0 %v1347_v55 }
 0x3eb   : > { %1133 = vmatpush.bf16.msrb.mxu0 %v1346_v58 }
 0x448   : > { %v850_v59 = vpop.f32.mrf.mxu2 }
 0x449   : > { %v857_v60 = vpack.c.bf16 %v850_v59, %v850_v59  ;;  %v1345_v59 = vld [vmem:[%s1935_s12 + $0x10] sm:$0xff] }
 0x44a   : > { %1134 = vmatpush.bf16.msrb.mxu0 %v1345_v59 }
 0x44b   : > { %1289 = vmatmul.msk.bf16.vlgmr.msrb.gmra.mxu2 %vm652_vm5, %v857_v60 }
 0x450   : > { %v831_v61 = vpop.f32.mrf.mxu1  ;;  %v852_v62 = vpop.f32.mrf.mxu2 }
 0x451   : > { %v856_v63 = vpack.c.bf16 %v831_v61, %v831_v61  ;;  %v1344_v62 = vld [vmem:[%s1935_s12 + $0x8] sm:$0xff] }
 0x452   : > { %1135 = vmatpush.bf16.msrb.mxu0 %v1344_v62 }
 0x453   : > { %v812_v1 = vpop.f32.mrf.mxu0  ;;  %1288 = vmatmul.msk.bf16.vlgmr.msra.gmra.mxu1 %vm652_vm5, %v856_v63 }
 0x454   : > { %v855_v2 = vpack.c.bf16 %v812_v1, %v812_v1 }
 0x456   : > { %1287 = vmatmul.msk.bf16.vlgmr.msra.gmra.mxu0 %vm652_vm5, %v855_v2 }
 0x458   : > { %v833_v3 = vpop.f32.mrf.mxu1 }
 0x45b   : > { %v814_v4 = vpop.f32.mrf.mxu0 }
 0x45c   : > { %v1343_v4 = vld [vmem:[%s1935_s12] sm:$0xff] }
 0x45d   : > { %v877_v5 = vpop.f32.mrf.mxu3  ;;  %1136 = vmatpush.bf16.msrb.mxu0 %v1343_v4 }
 0x45e   : > { %v938_v11 = vsel %vm499_vm0, %v877_v5, 0.0 }
 0x465   : > { %v879_v6 = vpop.f32.mrf.mxu3 }
 0x4ce   : > { %v934_v7 = vpop.f32.mrf.mxu2 }
 0x4cf   : > { %v943_v18 = vsel %vm499_vm0, %v934_v7, 0.0 }
 0x4d0   : > { %v915_v9 = vpop.f32.mrf.mxu1 }
 0x4d1   : > { %v941_v14 = vsel %vm499_vm0, %v915_v9, 0.0 }
 0x4d3   : > { %v896_v10 = vpop.f32.mrf.mxu0 }
 0x4d4   : > { %v939_v12 = vsel %vm499_vm0, %v896_v10, 0.0 }
 0x4d5   : > { %v940_v13 = vadd.f32 %v939_v12, %v938_v11 }
 0x4d6   : > { %v936_v15 = vpop.f32.mrf.mxu2 }
 0x4d7   : > { %v942_v16 = vadd.f32 %v941_v14, %v940_v13 }
 0x4d8   : > { %v917_v19 = vpop.f32.mrf.mxu1 }
 0x4d9   : > { %v944_v20 = vadd.f32 %v943_v18, %v942_v16 }
 0x4db   : > { %v898_v21 = vpop.f32.mrf.mxu0  ;;  %v949_v22 = vadd.f32 %v1419_v17, %v944_v20 }
 0x4dd   : > { %v1844_v23 = vadd.f32 %v949_v22, %v1743_v0 }
 0x4df   : > { %v953_v24 = vsel %vm499_vm0, %v1844_v23, 0.0 }
 0x4e0   : > { %954 = vadd.xlane.f32.xlu2 %v953_v24 }
 0x553   : > { %v955_v25 = vpop.xlane.xlu2 %954 }
 0x554   : > { %v956_v26 = vmul.f32 %v955_v25, %v1747_v8 }
 0x556   : > { %v957_v27 = vsub.f32 %v1844_v23, %v956_v26 }
 0x558   : > { %v958_v28 = vmul.f32 %v957_v27, %v957_v27 }
 0x55a   : > { %v959_v29 = vsel %vm499_vm0, %v958_v28, 0.0 }
 0x55b   : > { %960 = vadd.xlane.f32.xlu0 %v959_v29 }
 0x5ce   : > { %v961_v32 = vpop.xlane.xlu0 %960 }
 0x5cf   : > { %v962_v0 = vmul.f32 %v961_v32, %v1747_v8  ;;  %v1421_v8 = vld [vmem:[%s1932_s9] ss:$0 sm:$0xff] }
 0x5d0   : > { %v1423_v32 = vld [vmem:[%s1936_s13] ss:$0 sm:$0xff] }
 0x5d1   : > { %v963_v33 = vadd.f32 1e-05, %v962_v0 }
 0x5d3   : > { %1444 = vrsqrt.f32 %v963_v33  ;;  %vm970_vm8 = vweird.f32 %v963_v33 }
 0x5d9   : > { %v1445_v34 = vpop.eup %1444 }
 0x5da   : > { %v965_v35 = vmul.f32 %v1445_v34, %v963_v33  ;;  %vm971_vm7 = vweird.f32 %v1445_v34 }
 0x5db   : > { %vm972_vm9 = vmor %vm970_vm8, %vm971_vm7 }
 0x5dc   : > { %v966_v36 = vmul.f32 %v1445_v34, %v965_v35 }
 0x5de   : > { %v967_v37 = vmul.f32 0.5, %v966_v36 }
 0x5e0   : > { %v968_v38 = vsub.f32 1.5, %v967_v37 }
 0x5e2   : > { %v969_v39 = vmul.f32 %v1445_v34, %v968_v38 }
 0x5e4   : > { %v973_v41 = vsel %vm972_vm9, %v1445_v34, %v969_v39 }
 0x5e5   : > { %v974_v42 = vmul.f32 %v973_v41, %v957_v27 }
 0x5e7   : > { %v978_v43 = vmul.f32 %v1420_v40, %v974_v42 }
 0x5e9   : > { %v982_v44 = vadd.f32 %v1421_v8, %v978_v43 }
 0x5eb   : > { %v983_v45 = vpack.c.bf16 %v982_v44, %v982_v44 }
 0x5ed   : > { %1298 = vmatmul.msk.bf16.vlgmr.msrb.gmra.mxu3 %vm499_vm0, %v983_v45 }
 0x670   : > { %v1016_v49 = vpop.f32.mrf.mxu3 }
 0x671   : > { %v1017_v50 = vadd.f32 %v1422_v47, %v1016_v49 }
 0x673   : > { %v1021_v51 = vmul.f32 0.70710677, %v1017_v50  ;;  %v1020_v28 = vmul.f32 0.5, %v1017_v50 }
 0x675   : > { %v1022_v53 = vand.u32 2147483647, %v1021_v51  ;;  %vm1055_vm14 = vcmp.lt.f32.partialorder %v1021_v51, 0.0 }
 0x677   : > { %v1023_v54 = vmul.f32 0.3275911, %v1022_v53  ;;  %v1049_v10 = vsub.f32 0.0, %v1022_v53 }
 0x678   : > { %v1018_v56 = vpop.f32.mrf.mxu3 }
 0x679   : > { %v1024_v57 = vadd.f32 1.0, %v1023_v54  ;;  %v1050_v13 = vmul.f32 %v1049_v10, %v1022_v53 }
 0x67b   : > { %1446 = vrcp.f32 %v1024_v57  ;;  %v1036_v1 = vand.u32 2147483648, %v1024_v57  ;;  %v1034_v3 = vand.u32 2147483647, %v1024_v57  ;;  %vm1030_vm11 = vweird.f32 %v1024_v57 }
 0x67c   : > { %v1051_v16 = vmul.f32 1.442695, %v1050_v13 }
 0x67d   : > { %v1037_v6 = vor.u32 1.1754944e-38, %v1036_v1  ;;  %vm1035_vm13 = vcmp.eq.f32.partialorder %v1034_v3, 8.507059e+37 }
 0x67e   : > { %1448 = vpow2.f32 %v1051_v16 }
 0x681   : > { %v1447_v60 = vpop.eup %1446 }
 0x682   : > { %v1026_v61 = vmul.f32 %v1447_v60, %v1024_v57  ;;  %vm1031_vm10 = vweird.f32 %v1447_v60 }
 0x683   : > { %vm1032_vm12 = vmor %vm1030_vm11, %vm1031_vm10 }
 0x684   : > { %v1027_v63 = vsub.f32 1.0, %v1026_v61  ;;  %v1449_v22 = vpop.eup %1448 }
 0x686   : > { %v1028_v2 = vmul.f32 %v1447_v60, %v1027_v63 }
 0x688   : > { %v1029_v5 = vadd.f32 %v1447_v60, %v1028_v2 }
 0x68a   : > { %v1033_v7 = vsel %vm1032_vm12, %v1447_v60, %v1029_v5 }
 0x68b   : > { %v1038_v9 = vsel %vm1035_vm13, %v1037_v6, %v1033_v7 }
 0x68c   : > { %v1040_v11 = vmul.f32 1.0614054, %v1038_v9 }
 0x68e   : > { %v1041_v12 = vadd.f32 -1.4531521, %v1040_v11 }
 0x690   : > { %v1042_v14 = vmul.f32 %v1041_v12, %v1038_v9 }
 0x692   : > { %v1043_v15 = vadd.f32 1.4214138, %v1042_v14 }
 0x694   : > { %v1044_v17 = vmul.f32 %v1043_v15, %v1038_v9 }
 0x696   : > { %v1045_v18 = vadd.f32 -0.28449672, %v1044_v17 }
 0x698   : > { %v1046_v19 = vmul.f32 %v1045_v18, %v1038_v9 }
 0x69a   : > { %v1047_v20 = vadd.f32 0.2548296, %v1046_v19 }
 0x69c   : > { %v1048_v21 = vmul.f32 %v1047_v20, %v1038_v9 }
 0x69e   : > { %v1053_v24 = vmul.f32 %v1449_v22, %v1048_v21 }
 0x6a0   : > { %v1054_v25 = vsub.f32 1.0, %v1053_v24 }
 0x6a2   : > { %v1056_v26 = vsub.f32 0.0, %v1054_v25 }
 0x6a4   : > { %v1057_v27 = vsel %vm1055_vm14, %v1056_v26, %v1054_v25 }
 0x6a5   : > { %v1058_v29 = vadd.f32 1.0, %v1057_v27 }
 0x6a7   : > { %v1059_v30 = vmul.f32 %v1058_v29, %v1020_v28 }
 0x6a9   : > { %v1060_v31 = vpack.c.bf16 %v1059_v30, %v1059_v30 }
 0x6ab   : > { %1137 = vmatmul.bf16.vlgmr.msrb.gmra.mxu0 %v1060_v31 }
 0x728   : > { %v1138_v0 = vpop.f32.mrf.mxu0 }
 0x729   : > { %v1139_v33 = vadd.f32 %v1423_v32, %v1138_v0 }
 0x72b   : > { %v1142_v34 = vadd.f32 %v1139_v33, %v1844_v23 }
 0x72d   : > { %1143 = vst.msk [vmem:[%s490_s20] sm:$0xff] %vm499_vm0, %v1142_v34 }
 0x72e   : > { %1537 = shalt.err (!%p1534_p8)
}
 0x72f   : > { %1359 = dma.vmem_to_hbm [thread:$0]  (%p1703_p5), %s1158_s21, 128, %s1160_s26, %s1145_s17  }
 0x730   : > { %v1140_v23 = vpop.f32.mrf.mxu0 }
 0x731 PF: > { %p1376_p9 = scmp.ge.s32.totalorder %s1580_s16, 2  ;;  %s1171_s18 = sand.u32 1, %s1568_s29  }
 0x732   : > { %s1172_s20 = scalar_lea.sflag [#allocation4], %s1171_s18 }
 0x733   : > { %p1369_p10 = pnand %p1376_p9, %p1707_p6 }
 0x735   : > { %p1370_p11 = pneg %p1369_p10 }
 0x737   : > { %1563 = dma.done.wait (%p1370_p11), %s1172_s20, 128  }
 0x738   : > { %1565 = vsyncadd (%p1370_p11), %s1172_s20, 4294967168  ;;  %s1952_s16 = sld [smem:[#allocation12_spill]]  ;;  %s1955_s29 = smov %s1572_s30 }
 0x739   : > { %s1953_s0 = sld [smem:[#allocation11_spill]] }
 0x73a   : > { %s1954_s15 = sld [smem:[#allocation13_spill]] }
 0x73e   : > { %p26_p12 = scmp.ge.s32.totalorder %s1952_s16, 4  }
 0x73f   : > { %s1956_s30 = smov %s1953_s0 }
 0x740   :  { %28 = sbr.rel (!%p26_p12) target bundleno = 7 (0x7), region = 120 }
 0x745   :  { %1178 = vsyncpa [#allocation3], 1 }
 0x746   :  { %1180 = vsyncpa [#allocation3 + $0x1], 1 }
 0x747   :  { %1181 = vsyncpa [#allocation6], 1 }
 0x748   :  { %1182 = vsyncpa [#allocation4], 1 }
 0x749   :  { %1184 = vsyncpa [#allocation4 + $0x1], 1 }

</bundles_post_ra>
